<compile_context>
chip_gen: v6e
topology: v6e:2x2x1
jax: 0.10.0
libtpu: 0.0.40
codegen_flags: <defaults>
</compile_context>

<pallas_src>
import jax
import jax.numpy as jnp
from jax.experimental import pallas as pl
from jax.experimental.pallas import tpu as pltpu

_TILE_BYTES = 4 << 20      # ~4 MiB per tile; 2x in + 2x out double buffers ~= 16 MiB
_VMEM_LIMIT = 32 << 20     # explicit scoped-VMEM limit (v5e default is only 16 MiB)


def _make_affine_kernel(scale, offset):
    # scale/offset are Python floats -> weakly-typed constants, so the FMA stays
    # in the input dtype (bf16 stays bf16 on v6e/v7x; f32 stays f32).
    def kernel(f_ref, o_ref):
        f = f_ref[...]
        o_ref[...] = (f * scale + offset).astype(o_ref.dtype)
    return kernel


def _choose_tm(rows, lane, itemsize):
    """Row-tile size: sublane-aligned, ~4 MiB, >= ~4 grid steps when possible."""
    sublane = max(8, 32 // itemsize)   # packed sublanes: 8 f32 / 16 bf16 / 32 int8
    if rows < sublane:
        return rows                    # block == full dim (allowed), single step
    tm = max(sublane, (_TILE_BYTES // (lane * itemsize)) // sublane * sublane)
    if rows >= 4 * sublane:
        # keep at least ~4 grid steps: megacore sharding on v7x + pipeline overlap
        tm = min(tm, max(sublane, (rows // 4) // sublane * sublane))
    tm = min(tm, (rows // sublane) * sublane)
    return tm


def _run_affine_pallas(x2d, kernel, out_dtype):
    rows, lane = x2d.shape
    itemsize = jnp.dtype(out_dtype).itemsize
    tm = _choose_tm(rows, lane, itemsize)
    grid = (pl.cdiv(rows, tm),)        # ragged last block is masked by Pallas
    return pl.pallas_call(
        kernel,
        out_shape=jax.ShapeDtypeStruct((rows, lane), out_dtype),
        grid=grid,
        in_specs=[pl.BlockSpec((tm, lane), lambda i: (i, 0))],
        out_specs=pl.BlockSpec((tm, lane), lambda i: (i, 0)),
        compiler_params=pltpu.CompilerParams(
            dimension_semantics=("parallel",),
            vmem_limit_bytes=_VMEM_LIMIT,
        ),
    )(x2d)


def affine_same_as_input_normalization(f, to_min, to_max, Xmin, Xmax):
    """Elementwise affine rescale of `f` from [Xmin, Xmax] to [to_min, to_max]."""
    to_min, to_max = float(to_min), float(to_max)
    Xmin, Xmax = float(Xmin), float(Xmax)
    # TODO(synk): Xmax == Xmin divides by zero, same as the PyTorch module.
    scale = (to_max - to_min) / (Xmax - Xmin)
    offset = to_min - Xmin * scale

    orig_shape = f.shape
    dtype = f.dtype
    if not jnp.issubdtype(dtype, jnp.floating):
        # TODO(synk): integer inputs follow PyTorch's promotion to float here.
        f = f.astype(jnp.float32)
        dtype = jnp.float32

    total = f.size
    if total == 0:
        return f.reshape(orig_shape)

    kernel = _make_affine_kernel(scale, offset)
    itemsize = jnp.dtype(dtype).itemsize
    del itemsize  # (used inside _choose_tm via out_dtype)

    # Largest lane width (multiple of 128) that divides the element count:
    # lane-dense unmasked stores, no padding, reshape is free (contiguous).
    lane = 0
    for cand in range(1024, 0, -128):
        if total % cand == 0:
            lane = cand
            break

    if lane > 0:
        out2d = _run_affine_pallas(f.reshape(total // lane, lane), kernel, dtype)
        return out2d.reshape(orig_shape)

    # total is not a multiple of 128 (rare): run the main chunk through the
    # kernel and the <128-element remainder through plain jnp, then stitch.
    flat = f.reshape(-1)
    main_len = (total // 128) * 128
    if main_len == 0:
        # fewer than 128 elements: a single fused jnp op is already optimal
        return (flat * scale + offset).astype(dtype).reshape(orig_shape)
    main2d = flat[:main_len].reshape(main_len // 128, 128)
    main_out = _run_affine_pallas(main2d, kernel, dtype).reshape(-1)
    tail_out = (flat[main_len:] * scale + offset).astype(dtype)
    return jnp.concatenate([main_out, tail_out]).reshape(orig_shape)


if __name__ == "__main__":
    # Deterministic "module init" parameters (synthetic; not loaded from disk)
    to_min, to_max = -1.0, 1.0
    Xmin, Xmax = 0.0, 5.0

    key = jax.random.PRNGKey(0)
    # NCHW input, small shape (2*4*16*16 = 2048 elements -> pure Pallas path)
    x = jax.random.uniform(key, (2, 4, 16, 16), dtype=jnp.float32,
                           minval=Xmin, maxval=Xmax)

    out = affine_same_as_input_normalization(x, to_min, to_max, Xmin, Xmax)
    out = jax.block_until_ready(out)

    ref = (to_max - to_min) * (x - Xmin) / (Xmax - Xmin) + to_min
    assert out.shape == x.shape and out.dtype == x.dtype
    assert jnp.allclose(out, ref, atol=1e-5, rtol=1e-5)

    # Exercise the ragged (non-multiple-of-128) stitch path as well.
    key2 = jax.random.PRNGKey(1)
    y = jax.random.uniform(key2, (3, 5, 7, 11), dtype=jnp.float32,
                           minval=Xmin, maxval=Xmax)
    out2 = jax.block_until_ready(
        affine_same_as_input_normalization(y, to_min, to_max, Xmin, Xmax))
    ref2 = (to_max - to_min) * (y - Xmin) / (Xmax - Xmin) + to_min
    assert out2.shape == y.shape and out2.dtype == y.dtype
    assert jnp.allclose(out2, ref2, atol=1e-5, rtol=1e-5)

    print("KERNEL_OK")
</pallas_src>

<mosaic_0001>
module attributes {stable_mosaic.version = 11 : i64} {
  func.func @kernel(%arg0: i32, %arg1: memref<2x1024xf32, #tpu.memory_space<vmem>>, %arg2: memref<2x1024xf32, #tpu.memory_space<vmem>>) attributes {dimension_semantics = [#tpu.dimension_semantics<parallel>], iteration_bounds = array<i64: 1>, scalar_prefetch = 0 : i64, scratch_operands = 0 : i64, tpu.core_type = #tpu.core_type<tc>, window_params = [{transform_indices = @transform_0, window_bounds = array<i64: 2, 1024>}, {transform_indices = @transform_1, window_bounds = array<i64: 2, 1024>}]} {
    %c0 = arith.constant 0 : index
    %c0_0 = arith.constant 0 : index
    %0 = vector.load %arg1[%c0, %c0_0] : memref<2x1024xf32, #tpu.memory_space<vmem>>, vector<2x1024xf32>
    %cst = arith.constant 4.000000e-01 : f32
    %1 = vector.broadcast %cst : f32 to vector<2x1024xf32>
    %2 = arith.mulf %0, %1 : vector<2x1024xf32>
    %cst_1 = arith.constant -1.000000e+00 : f32
    %3 = vector.broadcast %cst_1 : f32 to vector<2x1024xf32>
    %4 = arith.addf %2, %3 : vector<2x1024xf32>
    %c0_2 = arith.constant 0 : index
    %c0_3 = arith.constant 0 : index
    %5 = vector.load %arg2[%c0_2, %c0_3] : memref<2x1024xf32, #tpu.memory_space<vmem>>, vector<2x1024xf32>
    tpu.vector_store %arg2[%c0_2, %c0_3], %4 {strides = array<i32>} : memref<2x1024xf32, #tpu.memory_space<vmem>>, vector<2x1024xf32>,
    return
  }
  func.func @transform_0(%arg0: i32) -> (i32, i32) {
    %c0_i32 = arith.constant 0 : i32
    %c0_i32_0 = arith.constant 0 : i32
    return %arg0, %c0_i32 : i32, i32
  }
  func.func @transform_1(%arg0: i32) -> (i32, i32) {
    %c0_i32 = arith.constant 0 : i32
    %c0_i32_0 = arith.constant 0 : i32
    return %arg0, %c0_i32 : i32, i32
  }
}

</mosaic_0001>

<bundles_post_ra>
// kernel: tpu_custom_call.1
= control target key start
LH: loop header
LB: loop body
LE: loop exit
PB: predicated region body
PF: predicated region fallthrough
CT: control target
= control target key end

     0   :  { %6 = vsyncpa [#allocation3], 0  ;;  %s108_s0 = inlined_call_operand.hbm [shape: f32[2,1024], index: 0, kind: input, shape index: {}]   ;;  %s109_s1 = inlined_call_operand.hbm [shape: f32[2,1024], index: 1, kind: output, shape index: {}]  }
   0x1   :  { %7 = vsyncpa [#allocation4], 0  ;;  %s90_s6 = smov [#allocation2]  }
   0x2   :  { %s14_s7 = sshll.u32 %s90_s6, 4  ;;  %s15_s7 = int_to_ptr.vmem [resolvable:$true] %s14_s7 }
   0x3   :  { %s54_s8 = scalar_lea.vmem %s15_s7, 256  ;;  %p59_p1 = scmp.lt.s32.totalorder %s15_s7, %s15_s7 }
   0x4   :  { %p55_p0 = scmp.ne.s32.totalorder %s15_s7, %s54_s8  ;;  %p60_p2 = scmp.lt.s32.totalorder %s54_s8, %s54_s8 }
   0x6   :  { %p61_p3 = por %p60_p2, %p59_p1 }
   0x8   :  { %p62_p4 = pnand %p61_p3, %p55_p0 }
   0xa   :  { %65 = shalt.err (!%p62_p4)
}
   0xb   :  { %17 = dma.hbm_to_vmem [thread:$0]  %s108_s0, 256, %s15_s7, [#allocation3]  }
   0xc   :  { %86 = dma.done.wait [#allocation3], 256  }
   0xd   :  { %87 = vsyncadd [#allocation3], 4294967040  ;;  %v21_v0 = vld [vmem:[#allocation2] sm:$0xff]  ;;  %v22_v1 = vld [vmem:[#allocation2 + $0x8] sm:$0xff]  ;;  %s91_s11 = smov [#allocation5]  }
   0xe   :  { %s35_s12 = sshll.u32 %s91_s11, 4  ;;  %v23_v2 = vmul.f32 0.4, %v21_v0  ;;  %v24_v3 = vmul.f32 0.4, %v22_v1  ;;  %s36_s12 = int_to_ptr.vmem [resolvable:$true] %s35_s12 }
   0xf   :  { %s66_s13 = scalar_lea.vmem %s36_s12, 256  ;;  %p71_p6 = scmp.lt.s32.totalorder %s36_s12, %s36_s12 }
  0x10   :  { %v25_v4 = vadd.f32 -1.0, %v23_v2  ;;  %v26_v5 = vadd.f32 -1.0, %v24_v3  ;;  %p67_p5 = scmp.ne.s32.totalorder %s36_s12, %s66_s13  ;;  %p72_p7 = scmp.lt.s32.totalorder %s66_s13, %s66_s13 }
  0x12   :  { %27 = vst [vmem:[#allocation5] sm:$0xff] %v25_v4  ;;  %28 = vst [vmem:[#allocation5 + $0x8] sm:$0xff] %v26_v5  ;;  %p73_p8 = por %p72_p7, %p71_p6 }
  0x14   :  { %p74_p9 = pnand %p73_p8, %p67_p5 }
  0x16   :  { %77 = shalt.err (!%p74_p9)
}
  0x17   :  { %38 = dma.vmem_to_hbm [thread:$0]  %s36_s12, 256, %s109_s1, [#allocation4]  }
  0x18   :  { %88 = dma.done.wait [#allocation4], 256  }
  0x19   :  { %89 = vsyncadd [#allocation4], 4294967040 }
  0x1a   :  { %42 = vsyncpa [#allocation3], 1 }
  0x1b   :  { %43 = vsyncpa [#allocation4], 1 }

</bundles_post_ra>
